<compile_context>
chip_gen: v7x
topology: tpu7x:2x2x1
jax: 0.10.0
libtpu: 0.0.40
codegen_flags: <defaults>
</compile_context>

<pallas_src>
import functools

import jax
import jax.numpy as jnp
from jax import lax
from jax.experimental import pallas as pl
from jax.experimental.pallas import tpu as pltpu


def _round_up(x, m):
    return ((x + m - 1) // m) * m


def _contrastive_loss_kernel(x_ref, o_ref, *, n_total, tile_n):
    i = pl.program_id(0)
    x = x_ref[...].astype(jnp.float32)                   # (tile_n, C) tile, f32 math
    tn, c = x.shape

    # logsumexp over columns 1: — mask column 0 with a scalar -inf once;
    # exp(-inf - m) == 0, so no second select is needed.
    # NOTE: degenerate C == 1 would give NaN here (PyTorch gives -inf); not handled.
    cols = lax.broadcasted_iota(jnp.int32, (tn, c), 1)
    masked = jnp.where(cols == 0, -jnp.inf, x)
    m = jnp.max(masked, axis=1, keepdims=True)           # (tile_n, 1), max over cols 1:
    e = jnp.exp(masked - m)                               # 0 at column 0
    lse = jnp.log(jnp.sum(e, axis=1, keepdims=True)) + m  # logsumexp(x[:, 1:], dim=1)

    loss = lse - x[:, 0:1]                                # (tile_n, 1)

    # Mask padded rows of the (possibly ragged) last tile out of the partial sum.
    if n_total % tile_n != 0:
        rows = i * tile_n + lax.broadcasted_iota(jnp.int32, (tn, 1), 0)
        loss = jnp.where(rows < n_total, loss, 0.0)

    partial = jnp.sum(loss)
    # Lane-dense (1, 128) output row (unmasked store); wrapper finishes the mean.
    o_ref[...] = jnp.full((1, 128), partial, dtype=jnp.float32)


def contrastive_loss(x, labels=None, *, tile_n=512):
    # labels are unused, exactly as in the PyTorch forward. Input is DMA'd in
    # its native dtype (bf16 stays bf16 in HBM); cast happens inside the kernel.
    n, c = x.shape
    tn = min(tile_n, _round_up(n, 8))                     # sublane-aligned row tile
    num_tiles = pl.cdiv(n, tn)

    kernel = functools.partial(_contrastive_loss_kernel, n_total=n, tile_n=tn)
    partials = pl.pallas_call(
        kernel,
        out_shape=jax.ShapeDtypeStruct((num_tiles, 128), jnp.float32),
        grid_spec=pltpu.PrefetchScalarGridSpec(
            num_scalar_prefetch=0,
            grid=(num_tiles,),
            in_specs=[pl.BlockSpec((tn, c), lambda i: (i, 0))],
            out_specs=pl.BlockSpec((1, 128), lambda i: (i, 0)),
        ),
        compiler_params=pltpu.CompilerParams(
            dimension_semantics=("parallel",)),           # megacore sharding on v7x
        cost_estimate=pl.CostEstimate(
            flops=6 * n * c,
            transcendentals=n * c,
            bytes_accessed=n * c * x.dtype.itemsize + num_tiles * 128 * 4),
    )(x)

    # All 128 lanes of each row hold the same per-tile partial; finish the mean
    # with the TRUE batch size N.
    return jnp.sum(partials[:, 0]) / jnp.float32(n)


if __name__ == "__main__":
    key = jax.random.PRNGKey(0)
    kx, kl = jax.random.split(key)

    # batch = 8 samples, 32 logits each (column 0 is the positive logit).
    N, C = 8, 32
    x = jax.random.normal(kx, (N, C), dtype=jnp.float32)
    labels = jax.random.randint(kl, (N,), 0, C)   # unused, mirrors PyTorch signature

    loss = contrastive_loss(x, labels)
    jax.block_until_ready(loss)
    ref = jnp.mean(-x[:, 0] + jax.scipy.special.logsumexp(x[:, 1:], axis=1))
    assert jnp.allclose(loss, ref, atol=1e-5, rtol=1e-5), (loss, ref)

    # Second check: N not a multiple of the sublane tile — exercises the
    # padded-row mask and the true-N mean divisor.
    N2 = 10
    x2 = jax.random.normal(kl, (N2, C), dtype=jnp.float32)
    loss2 = contrastive_loss(x2, None)
    jax.block_until_ready(loss2)
    ref2 = jnp.mean(-x2[:, 0] + jax.scipy.special.logsumexp(x2[:, 1:], axis=1))
    assert jnp.allclose(loss2, ref2, atol=1e-5, rtol=1e-5), (loss2, ref2)

    print("KERNEL_OK")
</pallas_src>

<mosaic_0001>
module attributes {stable_mosaic.version = 11 : i64} {
  func.func @_contrastive_loss_kernel(%arg0: i32, %arg1: memref<8x32xf32, #tpu.memory_space<vmem>>, %arg2: memref<1x128xf32, #tpu.memory_space<vmem>>) attributes {dimension_semantics = [#tpu.dimension_semantics<parallel>], iteration_bounds = array<i64: 1>, scalar_prefetch = 0 : i64, scratch_operands = 0 : i64, tpu.core_type = #tpu.core_type<tc>, window_params = [{transform_indices = @transform_0, window_bounds = array<i64: 8, 32>}, {transform_indices = @transform_1, window_bounds = array<i64: 1, 128>}]} {
    %c0 = arith.constant 0 : index
    %c0_0 = arith.constant 0 : index
    %0 = vector.load %arg1[%c0, %c0_0] : memref<8x32xf32, #tpu.memory_space<vmem>>, vector<8x32xf32>
    %1 = tpu.iota {dimensions = array<i32: 1>} : vector<8x32xi32>
    %c0_i32 = arith.constant 0 : i32
    %2 = vector.broadcast %c0_i32 : i32 to vector<8x32xi32>
    %3 = arith.cmpi eq, %1, %2 : vector<8x32xi32>
    %cst = arith.constant 0xFF800000 : f32
    %4 = vector.broadcast %cst : f32 to vector<8x32xf32>
    %5 = arith.select %3, %4, %0 : vector<8x32xi1>, vector<8x32xf32>
    %cst_1 = arith.constant dense<0xFF800000> : vector<8xf32>
    %6 = vector.multi_reduction <maximumf>, %5, %cst_1 [1] : vector<8x32xf32> to vector<8xf32>
    %7 = vector.shape_cast %6 : vector<8xf32> to vector<8x1xf32>
    %8 = vector.broadcast %7 : vector<8x1xf32> to vector<8x32xf32>
    %9 = arith.subf %5, %8 : vector<8x32xf32>
    %10 = math.exp %9 : vector<8x32xf32>
    %cst_2 = arith.constant dense<0.000000e+00> : vector<8xf32>
    %11 = vector.multi_reduction <add>, %10, %cst_2 [1] : vector<8x32xf32> to vector<8xf32>
    %12 = vector.shape_cast %11 : vector<8xf32> to vector<8x1xf32>
    %13 = math.log %12 : vector<8x1xf32>
    %14 = arith.addf %13, %7 : vector<8x1xf32>
    %15 = vector.extract_strided_slice %0 {offsets = [0, 0], sizes = [8, 1], strides = [1, 1]} : vector<8x32xf32> to vector<8x1xf32>
    %16 = arith.subf %14, %15 : vector<8x1xf32>
    %17 = vector.shape_cast %16 : vector<8x1xf32> to vector<1x8x1xf32>
    %cst_3 = arith.constant dense<0.000000e+00> : vector<1xf32>
    %18 = vector.multi_reduction <add>, %17, %cst_3 [1, 2] : vector<1x8x1xf32> to vector<1xf32>
    %19 = vector.shape_cast %18 : vector<1xf32> to vector<1x1x1xf32>
    %20 = vector.extract %19[0, 0, 0] : f32 from vector<1x1x1xf32>
    %21 = vector.broadcast %20 : f32 to vector<1x128xf32>
    %c0_4 = arith.constant 0 : index
    %c0_5 = arith.constant 0 : index
    %22 = vector.load %arg2[%c0_4, %c0_5] : memref<1x128xf32, #tpu.memory_space<vmem>>, vector<1x128xf32>
    tpu.vector_store %arg2[%c0_4, %c0_5], %21 {strides = array<i32>} : memref<1x128xf32, #tpu.memory_space<vmem>>, vector<1x128xf32>,
    return
  }
  func.func @transform_0(%arg0: i32) -> (i32, i32) {
    %c0_i32 = arith.constant 0 : i32
    %c0_i32_0 = arith.constant 0 : i32
    return %arg0, %c0_i32 : i32, i32
  }
  func.func @transform_1(%arg0: i32) -> (i32, i32) {
    %c0_i32 = arith.constant 0 : i32
    %c0_i32_0 = arith.constant 0 : i32
    return %arg0, %c0_i32 : i32, i32
  }
}

</mosaic_0001>

<bundles_post_ra>
// kernel: tpu_custom_call.1
= control target key start
LH: loop header
LB: loop body
LE: loop exit
PB: predicated region body
PF: predicated region fallthrough
CT: control target
= control target key end

     0   :  { %6 = vsyncpa [#allocation3], 0  ;;  %s160_s0 = inlined_call_operand.hbm [shape: f32[8,32], index: 0, kind: input, shape index: {}]   ;;  %s161_s1 = inlined_call_operand.hbm [shape: f32[1,128], index: 1, kind: output, shape index: {}]  }
   0x1   :  { %7 = vsyncpa [#allocation4], 0  ;;  %s124_s6 = smov [#allocation2]   ;;  %s76_s10 = scalar_lea.hbm %s160_s0, 128 }
   0x2   :  { %s14_s7 = sshll.u32 %s124_s6, 4  ;;  %p77_p0 = scmp.ne.s32.totalorder %s160_s0, %s76_s10  ;;  %s15_s7 = int_to_ptr.vmem [resolvable:$true] %s14_s7 }
   0x3   :  { %p80_p1 = scmp.lt.u32.totalorder %s76_s10, %s160_s0 }
   0x5   :  { %p82_p2 = pnand %p80_p1, %p77_p0 }
   0x7   :  { %85 = shalt.err (!%p82_p2)
}
   0x8   :  { %s86_s15 = scalar_lea.vmem %s15_s7, 128  ;;  %p91_p4 = scmp.lt.s32.totalorder %s15_s7, %s15_s7 }
   0x9   :  { %p87_p3 = scmp.ne.s32.totalorder %s15_s7, %s86_s15  ;;  %p92_p5 = scmp.lt.s32.totalorder %s86_s15, %s86_s15 }
   0xb   :  { %p93_p6 = por %p92_p5, %p91_p4 }
   0xd   :  { %p94_p7 = pnand %p93_p6, %p87_p3 }
   0xf   :  { %97 = shalt.err (!%p94_p7)
}
  0x10   :  { %17 = dma.hbm_to_vmem [thread:$0]  %s160_s0, 128, %s15_s7, [#allocation3]  }
  0x11   :  { %120 = dma.done.wait [#allocation3], 128  }
  0x12   :  { %121 = vsyncadd [#allocation3], 4294967168  ;;  %v22_v0 = vlaneseq  ;;  %vm26_vm1 = vcmask 261120   ;;  %v21_v2 = vld [vmem:[#allocation2] sm:$0xff]  ;;  %vm40_vm2 = vcmask 7168   ;;  %s125_s0 = smov [#allocation5]  }
  0x13   :  { %s59_s18 = sshll.u32 %s125_s0, 4  ;;  %s60_s18 = int_to_ptr.vmem [resolvable:$true] %s59_s18 }
  0x14   :  { %v23_v1 = vand.u32 127, %v22_v0  ;;  %s98_s20 = scalar_lea.vmem %s60_s18, 16  ;;  %s102_s21 = scalar_lea.vmem %s60_s18, 32 }
  0x15   :  { %p99_p8 = scmp.ne.s32.totalorder %s60_s18, %s98_s20  ;;  %p103_p9 = scmp.lt.s32.totalorder %s60_s18, %s60_s18 }
  0x16   :  { %vm24_vm0 = vcmp.eq.s32.totalorder %v23_v1, 0  ;;  %p104_p10 = scmp.lt.s32.totalorder %s102_s21, %s98_s20 }
  0x17   :  { %v25_v3 = vsel %vm24_vm0, -inf, %v21_v2 }
  0x18   :  { %v27_v4 = vsel %vm26_vm1, %v25_v3, -inf  ;;  %p105_p11 = por %p104_p10, %p103_p9 }
  0x19   :  { %28 = vmax.xlane.f32.xlu0 %v27_v4 }
  0x1a   :  { %p106_p12 = pnand %p105_p11, %p99_p8 }
  0xa6   :  { %v29_v5 = vpop.xlane.xlu0 %28 }
  0xa7   :  { %v30_v6 = vsub.f32 %v25_v3, %v29_v5 }
  0xa9   :  { %v31_v7 = vmul.f32 1.442695, %v30_v6 }
  0xab   :  { %72 = vpow2.f32 %v31_v7 }
  0xb5   :  { %v73_v8 = vpop.eup %72 }
  0xb6   :  { %v33_v9 = vsel %vm26_vm1, %v73_v8, 0.0 }
  0xb7   :  { %34 = vadd.xlane.f32.xlu0 %v33_v9 }
 0x144   :  { %v35_v10 = vpop.xlane.xlu0 %34 }
 0x145   :  { %74 = vlog2.f32 %v35_v10 }
 0x14f   :  { %v75_v11 = vpop.eup %74 }
 0x150   :  { %v37_v12 = vmul.f32 0.6931472, %v75_v11 }
 0x152   :  { %v38_v13 = vadd.f32 %v37_v12, %v29_v5 }
 0x154   :  { %v39_v14 = vsub.f32 %v38_v13, %v21_v2 }
 0x156   :  { %v41_v15 = vsel %vm40_vm2, %v39_v14, 0.0 }
 0x157   :  { %42 = vadd.xlane.f32.xlu1 %v41_v15 }
 0x1e4   :  { %v43_v16 = vpop.xlane.xlu1 %42 }
 0x1e5   :  { %v44_v17 = vrot.slane %v43_v16, 4 }
 0x1e7   :  { %v45_v18 = vadd.f32 %v44_v17, %v43_v16 }
 0x1e9   :  { %v46_v19 = vrot.slane %v45_v18, 2 }
 0x1eb   :  { %v47_v20 = vadd.f32 %v46_v19, %v45_v18 }
 0x1ed   :  { %v48_v21 = vrot.slane %v47_v20, 1 }
 0x1ef   :  { %v49_v22 = vadd.f32 %v48_v21, %v47_v20 }
 0x1f1   :  { %68 = vpush %v49_v22 }
 0x222   :  { %s69_s19 = spop %68 }
 0x223   :  { %v51_v23 = vstv %s69_s19 }
 0x224   :  { %52 = vst [vmem:[#allocation5] sm:$0x1] %v51_v23 }
 0x225   :  { %109 = shalt.err (!%p106_p12)
}
 0x226   :  { %s110_s24 = scalar_lea.hbm %s161_s1, 16 }
 0x227   :  { %p111_p13 = scmp.ne.s32.totalorder %s161_s1, %s110_s24  ;;  %p114_p0 = scmp.lt.u32.totalorder %s110_s24, %s161_s1 }
 0x229   :  { %p116_p1 = pnand %p114_p0, %p111_p13 }
 0x22b   :  { %119 = shalt.err (!%p116_p1)
}
 0x22c   :  { %62 = dma.vmem_to_hbm [thread:$0]  %s60_s18, 16, %s161_s1, [#allocation4]  }
 0x22d   :  { %122 = dma.done.wait [#allocation4], 16  }
 0x22e   :  { %123 = vsyncadd [#allocation4], 4294967280 }
 0x22f   :  { %66 = vsyncpa [#allocation3], 1 }
 0x230   :  { %67 = vsyncpa [#allocation4], 1 }

</bundles_post_ra>
